<compile_context>
chip_gen: v7x
topology: tpu7x:2x2x1
jax: 0.10.0
libtpu: 0.0.40
codegen_flags: <defaults>
</compile_context>

<pallas_src>
import functools
import math

import jax
import jax.numpy as jnp
from jax.experimental import pallas as pl
from jax.experimental.pallas import tpu as pltpu


def _round_up(x, m):
    return ((x + m - 1) // m) * m


def _pick_vmem_limit():
    """Generation-aware VMEM limit: ~48 MiB on v7x (64 MiB phys), ~96 MiB on v5e/v6e (128 MiB)."""
    cap = None
    try:
        info = pltpu.get_tpu_info()
        cap = getattr(info, "vmem_capacity_bytes", None)
    except Exception:
        cap = None
    if not cap:
        cap = 64 * 1024 * 1024  # conservative (v7x physical size)
    return min(int(cap) * 3 // 4, 96 * 1024 * 1024)


def _pick_tiles(n, block_m, block_k):
    """Aggregation tiles (tm, tk) and the padded node count n_pad (divisible by both)."""
    n128 = _round_up(max(n, 1), 128)
    if block_m is not None or block_k is not None:
        assert block_m is not None and block_k is not None
        assert block_m % 8 == 0 and block_k % 128 == 0
        tm, tk = block_m, block_k
        n_pad = _round_up(n, math.lcm(tm, tk))
    elif n128 <= 512:
        tm = tk = n128
        n_pad = n128
    else:
        # HBM-bound on A: big tiles (2-4 MiB A-tiles) to hide the ~0.35us per-step overhead.
        n_pad = _round_up(n, 512)
        tm = 512
        if n_pad % 2048 == 0:
            tk = 2048
        elif n_pad % 1024 == 0:
            tk = 1024
        else:
            tk = 512
    return tm, tk, n_pad


def _pick_rows_tile(n_pad):
    """Kernel 1 row tile: as fat as possible (it is mem-bound on x/h/ident streaming)."""
    if n_pad <= 2048:
        return n_pad
    for t in (2048, 1024, 512, 256, 128):
        if n_pad % t == 0:
            return t
    return 128


# --------------------- kernel 1: GCN linear + residual projection (two direct dots) ----------
def _proj_kernel(x_ref, wg_ref, bg_ref, wp_ref, bp_ref, h_ref, ident_ref):
    x = x_ref[...]
    h_ref[...] = (jnp.dot(x, wg_ref[...], preferred_element_type=jnp.float32)
                  + bg_ref[...]).astype(h_ref.dtype)
    ident_ref[...] = (jnp.dot(x, wp_ref[...], preferred_element_type=jnp.float32)
                      + bp_ref[...]).astype(ident_ref.dtype)


def _lin_kernel(x_ref, wg_ref, bg_ref, h_ref):
    h_ref[...] = (jnp.dot(x_ref[...], wg_ref[...], preferred_element_type=jnp.float32)
                  + bg_ref[...]).astype(h_ref.dtype)


# --------------------- kernel 2: tiled A_norm @ h with fused epilogue ------------------------
def _agg_kernel(a_ref, h_ref, ident_ref, gamma_ref, beta_ref, out_ref,
                *, eps, c_out, c_out_pad, tk, h_resident):
    k = pl.program_id(1)

    @pl.when(k == 0)
    def _():
        out_ref[...] = jnp.zeros_like(out_ref)

    if h_resident:
        # h is fully VMEM-resident (constant block index); slice the current k-chunk.
        h = h_ref[pl.ds(pl.multiple_of(k * tk, tk), tk), :]
    else:
        h = h_ref[...]

    # [TM, TK] @ [TK, Cout_pad] -> f32 accumulation directly in the resident output block.
    out_ref[...] += jnp.dot(a_ref[...], h, preferred_element_type=jnp.float32)

    @pl.when(k == pl.num_programs(1) - 1)
    def _():
        r = jnp.maximum(out_ref[...], 0.0)                     # ReLU
        # TODO(synk): training-mode dropout (nn.Dropout(0.1)) not emitted; eval-mode identity.
        inv_c = 1.0 / float(c_out)
        if c_out == c_out_pad:
            mu = jnp.sum(r, axis=-1, keepdims=True) * inv_c
            cen = r - mu
        else:
            # Padded lanes of r are exactly zero, so the mean needs no mask;
            # mask only the centered values so padding does not pollute the variance.
            mu = jnp.sum(r, axis=-1, keepdims=True) * inv_c
            lane = jax.lax.broadcasted_iota(jnp.int32, r.shape, dimension=1)
            cen = jnp.where(lane < c_out, r - mu, 0.0)
        var = jnp.sum(cen * cen, axis=-1, keepdims=True) * inv_c
        ln = cen * jax.lax.rsqrt(var + eps) * gamma_ref[...] + beta_ref[...]
        out_ref[...] = ln + ident_ref[...]


# ------------------------------------- wrapper ----------------------------------------------
def res_gcn_block(x, edge_index, params, *, eps=1e-5, agg_dtype=jnp.bfloat16,
                  block_m=None, block_k=None, h_resident=None):
    """x: [N, Cin] f32, edge_index: [2, E] int32 (row 0 = source, row 1 = target).

    agg_dtype: dtype of A_norm / h in the HBM-bound aggregation (accuracy knob; accumulation
    and epilogue stay f32). params with no "w_proj" => identity residual (Cin == Cout).
    """
    n, c_in = x.shape
    c_out = params["w_gcn"].shape[1]
    has_proj = "w_proj" in params

    # ---- glue: dense symmetric-normalized adjacency with self-loops (matches the module) ----
    src, dst = edge_index[0], edge_index[1]
    loop = jnp.arange(n, dtype=src.dtype)
    src = jnp.concatenate([src, loop])
    dst = jnp.concatenate([dst, loop])
    deg = jnp.zeros((n,), jnp.float32).at[src].add(1.0)        # degree(row), as in the module
    dinv = deg ** -0.5
    norm = dinv[src] * dinv[dst]
    # out[i] = sum_{e: dst[e]==i} norm[e] * h[src[e]]   ==>   A[dst, src] += norm
    a_norm = jnp.zeros((n, n), jnp.float32).at[dst, src].add(norm)
    # TODO(synk): for large sparse graphs replace the dense A with a block-skip
    # (PrefetchScalarGridSpec block mask / CSR gather) instead of O(N^2) densification.

    # ---- lane-dense padding + tile selection ----
    tm, tk, n_pad = _pick_tiles(n, block_m, block_k)
    c_in_pad = _round_up(c_in, 128)
    c_out_pad = _round_up(c_out, 128)
    vmem_limit = _pick_vmem_limit()

    x_p = jnp.zeros((n_pad, c_in_pad), jnp.float32).at[:n, :c_in].set(x)
    a_p = jnp.zeros((n_pad, n_pad), jnp.float32).at[:n, :n].set(a_norm).astype(agg_dtype)

    def pad_w(w):
        return jnp.zeros((c_in_pad, c_out_pad), jnp.float32).at[:c_in, :c_out].set(w)

    def pad_v(v):
        return jnp.zeros((1, c_out_pad), jnp.float32).at[:, :c_out].set(v)

    w_gcn, b_gcn = pad_w(params["w_gcn"]), pad_v(params["b_gcn"])
    gamma, beta = pad_v(params["gamma"]), pad_v(params["beta"])

    # ---- kernel 1: h = x@Wg+bg (and ident = x@Wp+bp), hoisted out of the reduction loop ----
    tm1 = _pick_rows_tile(n_pad)
    if has_proj:
        w_proj, b_proj = pad_w(params["w_proj"]), pad_v(params["b_proj"])
        h, ident = pl.pallas_call(
            _proj_kernel,
            out_shape=(jax.ShapeDtypeStruct((n_pad, c_out_pad), agg_dtype),
                       jax.ShapeDtypeStruct((n_pad, c_out_pad), jnp.float32)),
            grid=(n_pad // tm1,),
            in_specs=[
                pl.BlockSpec((tm1, c_in_pad), lambda i: (i, 0)),
                pl.BlockSpec((c_in_pad, c_out_pad), lambda i: (0, 0)),
                pl.BlockSpec((1, c_out_pad), lambda i: (0, 0)),
                pl.BlockSpec((c_in_pad, c_out_pad), lambda i: (0, 0)),
                pl.BlockSpec((1, c_out_pad), lambda i: (0, 0)),
            ],
            out_specs=(pl.BlockSpec((tm1, c_out_pad), lambda i: (i, 0)),
                       pl.BlockSpec((tm1, c_out_pad), lambda i: (i, 0))),
            compiler_params=pltpu.CompilerParams(
                dimension_semantics=("parallel",), vmem_limit_bytes=vmem_limit),
        )(x_p, w_gcn, b_gcn, w_proj, b_proj)
    else:
        assert c_in == c_out, "identity residual requires in_channels == out_channels"
        h = pl.pallas_call(
            _lin_kernel,
            out_shape=jax.ShapeDtypeStruct((n_pad, c_out_pad), agg_dtype),
            grid=(n_pad // tm1,),
            in_specs=[
                pl.BlockSpec((tm1, c_in_pad), lambda i: (i, 0)),
                pl.BlockSpec((c_in_pad, c_out_pad), lambda i: (0, 0)),
                pl.BlockSpec((1, c_out_pad), lambda i: (0, 0)),
            ],
            out_specs=pl.BlockSpec((tm1, c_out_pad), lambda i: (i, 0)),
            compiler_params=pltpu.CompilerParams(
                dimension_semantics=("parallel",), vmem_limit_bytes=vmem_limit),
        )(x_p, w_gcn, b_gcn)
        ident = x_p  # c_in_pad == c_out_pad

    # ---- h residency: keep the whole h in VMEM when small (kills the (n/TM)x re-stream) ----
    h_bytes = n_pad * c_out_pad * jnp.dtype(agg_dtype).itemsize
    if h_resident is None:
        h_resident = h_bytes <= 4 * 1024 * 1024
    if h_resident:
        h_spec = pl.BlockSpec((n_pad, c_out_pad), lambda i, k: (0, 0))
    else:
        h_spec = pl.BlockSpec((tk, c_out_pad), lambda i, k: (k, 0))

    # ---- kernel 2: tiled aggregation + fused ReLU / LayerNorm / residual-add epilogue ----
    out = pl.pallas_call(
        functools.partial(_agg_kernel, eps=eps, c_out=c_out, c_out_pad=c_out_pad,
                          tk=tk, h_resident=bool(h_resident)),
        out_shape=jax.ShapeDtypeStruct((n_pad, c_out_pad), jnp.float32),
        grid=(n_pad // tm, n_pad // tk),
        in_specs=[
            pl.BlockSpec((tm, tk), lambda i, k: (i, k)),            # A tile
            h_spec,                                                 # h (resident or tiled)
            pl.BlockSpec((tm, c_out_pad), lambda i, k: (i, 0)),     # residual tile
            pl.BlockSpec((1, c_out_pad), lambda i, k: (0, 0)),      # LN gamma
            pl.BlockSpec((1, c_out_pad), lambda i, k: (0, 0)),      # LN beta
        ],
        out_specs=pl.BlockSpec((tm, c_out_pad), lambda i, k: (i, 0)),
        compiler_params=pltpu.CompilerParams(
            dimension_semantics=("parallel", "arbitrary"),
            vmem_limit_bytes=vmem_limit),
    )(a_p, h, ident, gamma, beta)

    return out[:n, :c_out]


# ------------------------------- reference (plain JAX) --------------------------------------
def res_gcn_block_ref(x, edge_index, params, *, eps=1e-5, agg_dtype=jnp.float32):
    n = x.shape[0]
    src, dst = edge_index[0], edge_index[1]
    loop = jnp.arange(n, dtype=src.dtype)
    src = jnp.concatenate([src, loop])
    dst = jnp.concatenate([dst, loop])
    deg = jnp.zeros((n,), jnp.float32).at[src].add(1.0)
    dinv = deg ** -0.5
    norm = dinv[src] * dinv[dst]
    h = x @ params["w_gcn"] + params["b_gcn"][0]
    if agg_dtype == jnp.float32:
        msg = norm[:, None] * h[src]
        agg = jnp.zeros((n, h.shape[1]), jnp.float32).at[dst].add(msg)
    else:
        # model the reduced-precision aggregation path (quantized operands, f32 accumulation)
        a_norm = jnp.zeros((n, n), jnp.float32).at[dst, src].add(norm)
        a_norm = a_norm.astype(agg_dtype).astype(jnp.float32)
        h_q = h.astype(agg_dtype).astype(jnp.float32)
        agg = a_norm @ h_q
    r = jnp.maximum(agg, 0.0)
    mu = r.mean(-1, keepdims=True)
    var = ((r - mu) ** 2).mean(-1, keepdims=True)
    ln = (r - mu) / jnp.sqrt(var + eps) * params["gamma"][0] + params["beta"][0]
    if "w_proj" in params:
        ident = x @ params["w_proj"] + params["b_proj"][0]
    else:
        ident = x
    return ln + ident


# ----------------------------------------- main ---------------------------------------------
if __name__ == "__main__":
    key = jax.random.PRNGKey(0)

    def make_inputs(k, n, c_in, c_out, e, has_proj=True):
        k_x, k_e, k_wg, k_bg, k_wp, k_bp = jax.random.split(k, 6)
        x = jax.random.normal(k_x, (n, c_in), jnp.float32)
        edge_index = jax.random.randint(k_e, (2, e), 0, n, jnp.int32)
        bound = 1.0 / (c_in ** 0.5)
        params = {
            "w_gcn": jax.random.uniform(k_wg, (c_in, c_out), jnp.float32, -bound, bound),
            "b_gcn": jax.random.uniform(k_bg, (1, c_out), jnp.float32, -bound, bound),
            "gamma": jnp.ones((1, c_out), jnp.float32),
            "beta": jnp.zeros((1, c_out), jnp.float32),
        }
        if has_proj:
            params["w_proj"] = jax.random.uniform(k_wp, (c_in, c_out), jnp.float32, -bound, bound)
            params["b_proj"] = jax.random.uniform(k_bp, (1, c_out), jnp.float32, -bound, bound)
        return x, edge_index, params

    k1, k2, k3 = jax.random.split(key, 3)

    # 1) small graph, f32 aggregation -- strict parity with the module semantics
    x, ei, params = make_inputs(k1, 8, 16, 32, 24)
    out = jax.block_until_ready(res_gcn_block(x, ei, params, agg_dtype=jnp.float32))
    ref = res_gcn_block_ref(x, ei, params)
    assert out.shape == (8, 32)
    assert jnp.allclose(out, ref, atol=1e-4, rtol=1e-4), "f32 small mismatch vs reference"

    # 2) no-projection path (in_channels == out_channels -> identity residual)
    xn, ein, paramsn = make_inputs(k3, 8, 32, 32, 24, has_proj=False)
    outn = jax.block_until_ready(res_gcn_block(xn, ein, paramsn, agg_dtype=jnp.float32))
    refn = res_gcn_block_ref(xn, ein, paramsn)
    assert jnp.allclose(outn, refn, atol=1e-4, rtol=1e-4), "no-proj mismatch vs reference"

    # 3) medium graph, explicit small tiles + non-resident h -- exercises the (rows x reduction)
    #    grid, the pl.when init/epilogue, lcm row padding, and the tiled-h BlockSpec path.
    x2, ei2, params2 = make_inputs(k2, 300, 40, 96, 1500)
    out2 = jax.block_until_ready(
        res_gcn_block(x2, ei2, params2, agg_dtype=jnp.float32,
                      block_m=128, block_k=128, h_resident=False))
    ref2 = res_gcn_block_ref(x2, ei2, params2)
    assert out2.shape == (300, 96)
    assert jnp.allclose(out2, ref2, atol=5e-4, rtol=5e-4), "f32 medium mismatch vs reference"

    # 4) default bf16 adjacency / h for the HBM-bound aggregation (f32 accumulation/epilogue)
    out3 = jax.block_until_ready(res_gcn_block(x, ei, params))
    ref3 = res_gcn_block_ref(x, ei, params, agg_dtype=jnp.bfloat16)
    assert jnp.allclose(out3, ref3, atol=2e-2, rtol=2e-2), "bf16 mismatch vs reference"

    print("KERNEL_OK")
</pallas_src>

<mosaic_0001>
module attributes {stable_mosaic.version = 11 : i64} {
  func.func @_proj_kernel(%arg0: i32, %arg1: memref<128x128xf32, #tpu.memory_space<vmem>>, %arg2: memref<128x128xf32, #tpu.memory_space<vmem>>, %arg3: memref<1x128xf32, #tpu.memory_space<vmem>>, %arg4: memref<128x128xf32, #tpu.memory_space<vmem>>, %arg5: memref<1x128xf32, #tpu.memory_space<vmem>>, %arg6: memref<128x128xf32, #tpu.memory_space<vmem>>, %arg7: memref<128x128xf32, #tpu.memory_space<vmem>>) attributes {dimension_semantics = [#tpu.dimension_semantics<parallel>], iteration_bounds = array<i64: 1>, scalar_prefetch = 0 : i64, scratch_operands = 0 : i64, tpu.core_type = #tpu.core_type<tc>, window_params = [{transform_indices = @transform_0, window_bounds = array<i64: 128, 128>}, {pipeline_mode = #tpu.pipeline_mode<synchronous>, transform_indices = @transform_1, window_bounds = array<i64: 128, 128>}, {pipeline_mode = #tpu.pipeline_mode<synchronous>, transform_indices = @transform_2, window_bounds = array<i64: 1, 128>}, {pipeline_mode = #tpu.pipeline_mode<synchronous>, transform_indices = @transform_3, window_bounds = array<i64: 128, 128>}, {pipeline_mode = #tpu.pipeline_mode<synchronous>, transform_indices = @transform_4, window_bounds = array<i64: 1, 128>}, {transform_indices = @transform_5, window_bounds = array<i64: 128, 128>}, {transform_indices = @transform_6, window_bounds = array<i64: 128, 128>}]} {
    %c0 = arith.constant 0 : index
    %c0_0 = arith.constant 0 : index
    %0 = vector.load %arg1[%c0, %c0_0] : memref<128x128xf32, #tpu.memory_space<vmem>>, vector<128x128xf32>
    %c0_1 = arith.constant 0 : index
    %c0_2 = arith.constant 0 : index
    %1 = vector.load %arg2[%c0_1, %c0_2] : memref<128x128xf32, #tpu.memory_space<vmem>>, vector<128x128xf32>
    %cst = arith.constant dense<0.000000e+00> : vector<128x128xf32>
    %2 = tpu.matmul %0, %1, %cst {dimension_numbers = #tpu.dot_dimension_numbers<[1], [0], [0], [1], [0, 0, 1, 1], [], []>} : vector<128x128xf32>, vector<128x128xf32>, vector<128x128xf32> -> vector<128x128xf32>
    %c0_3 = arith.constant 0 : index
    %c0_4 = arith.constant 0 : index
    %3 = vector.load %arg3[%c0_3, %c0_4] : memref<1x128xf32, #tpu.memory_space<vmem>>, vector<1x128xf32>
    %4 = vector.broadcast %3 : vector<1x128xf32> to vector<128x128xf32>
    %5 = arith.addf %2, %4 : vector<128x128xf32>
    %c0_5 = arith.constant 0 : index
    %c0_6 = arith.constant 0 : index
    %6 = vector.load %arg6[%c0_5, %c0_6] : memref<128x128xf32, #tpu.memory_space<vmem>>, vector<128x128xf32>
    tpu.vector_store %arg6[%c0_5, %c0_6], %5 {strides = array<i32>} : memref<128x128xf32, #tpu.memory_space<vmem>>, vector<128x128xf32>,
    %c0_7 = arith.constant 0 : index
    %c0_8 = arith.constant 0 : index
    %7 = vector.load %arg4[%c0_7, %c0_8] : memref<128x128xf32, #tpu.memory_space<vmem>>, vector<128x128xf32>
    %cst_9 = arith.constant dense<0.000000e+00> : vector<128x128xf32>
    %8 = tpu.matmul %0, %7, %cst_9 {dimension_numbers = #tpu.dot_dimension_numbers<[1], [0], [0], [1], [0, 0, 1, 1], [], []>} : vector<128x128xf32>, vector<128x128xf32>, vector<128x128xf32> -> vector<128x128xf32>
    %c0_10 = arith.constant 0 : index
    %c0_11 = arith.constant 0 : index
    %9 = vector.load %arg5[%c0_10, %c0_11] : memref<1x128xf32, #tpu.memory_space<vmem>>, vector<1x128xf32>
    %10 = vector.broadcast %9 : vector<1x128xf32> to vector<128x128xf32>
    %11 = arith.addf %8, %10 : vector<128x128xf32>
    %c0_12 = arith.constant 0 : index
    %c0_13 = arith.constant 0 : index
    %12 = vector.load %arg7[%c0_12, %c0_13] : memref<128x128xf32, #tpu.memory_space<vmem>>, vector<128x128xf32>
    tpu.vector_store %arg7[%c0_12, %c0_13], %11 {strides = array<i32>} : memref<128x128xf32, #tpu.memory_space<vmem>>, vector<128x128xf32>,
    return
  }
  func.func @transform_0(%arg0: i32) -> (i32, i32) {
    %c0_i32 = arith.constant 0 : i32
    %c0_i32_0 = arith.constant 0 : i32
    return %arg0, %c0_i32 : i32, i32
  }
  func.func @transform_1(%arg0: i32) -> (i32, i32) {
    %c0_i32 = arith.constant 0 : i32
    %c0_i32_0 = arith.constant 0 : i32
    %c0_i32_1 = arith.constant 0 : i32
    return %c0_i32, %c0_i32_0 : i32, i32
  }
  func.func @transform_2(%arg0: i32) -> (i32, i32) {
    %c0_i32 = arith.constant 0 : i32
    %c0_i32_0 = arith.constant 0 : i32
    %c0_i32_1 = arith.constant 0 : i32
    return %c0_i32, %c0_i32_0 : i32, i32
  }
  func.func @transform_3(%arg0: i32) -> (i32, i32) {
    %c0_i32 = arith.constant 0 : i32
    %c0_i32_0 = arith.constant 0 : i32
    %c0_i32_1 = arith.constant 0 : i32
    return %c0_i32, %c0_i32_0 : i32, i32
  }
  func.func @transform_4(%arg0: i32) -> (i32, i32) {
    %c0_i32 = arith.constant 0 : i32
    %c0_i32_0 = arith.constant 0 : i32
    %c0_i32_1 = arith.constant 0 : i32
    return %c0_i32, %c0_i32_0 : i32, i32
  }
  func.func @transform_5(%arg0: i32) -> (i32, i32) {
    %c0_i32 = arith.constant 0 : i32
    %c0_i32_0 = arith.constant 0 : i32
    return %arg0, %c0_i32 : i32, i32
  }
  func.func @transform_6(%arg0: i32) -> (i32, i32) {
    %c0_i32 = arith.constant 0 : i32
    %c0_i32_0 = arith.constant 0 : i32
    return %arg0, %c0_i32 : i32, i32
  }
}

</mosaic_0001>

<bundles_post_ra>
// kernel: tpu_custom_call.1
= control target key start
LH: loop header
LB: loop body
LE: loop exit
PB: predicated region body
PF: predicated region fallthrough
CT: control target
= control target key end

     0   :  { %12 = vsyncpa [#allocation3], 0  ;;  %s1023_s0 = inlined_call_operand.hbm [shape: f32[128,128], index: 0, kind: input, shape index: {}]   ;;  %s1024_s1 = inlined_call_operand.hbm [shape: f32[128,128], index: 1, kind: input, shape index: {}]   ;;  %s1025_s2 = inlined_call_operand.vmem [shape: f32[1,128], index: 2, kind: input, shape index: {}]   ;;  %s1026_s3 = inlined_call_operand.hbm [shape: f32[128,128], index: 3, kind: input, shape index: {}]   ;;  %s1027_s4 = inlined_call_operand.vmem [shape: f32[1,128], index: 4, kind: input, shape index: {}]   ;;  %s1028_s5 = inlined_call_operand.hbm [shape: f32[128,128], index: 5, kind: output, shape index: {0}]   ;;  %s1029_s6 = inlined_call_operand.hbm [shape: f32[128,128], index: 6, kind: output, shape index: {1}]  }
   0x1   :  { %13 = vsyncpa [#allocation6], 0 }
   0x2   :  { %14 = vsyncpa [#allocation4], 0 }
   0x3   :  { %15 = vsyncpa [#allocation10], 0  ;;  %s850_s21 = smov [#allocation5]   ;;  %s851_s23 = smov [#allocation2]  }
   0x4   :  { %s33_s22 = sshll.u32 %s850_s21, 4  ;;  %s21_s24 = sshll.u32 %s851_s23, 4  ;;  %s34_s22 = int_to_ptr.vmem [resolvable:$true] %s33_s22  ;;  %s892_s24 = int_to_ptr.vmem [resolvable:$true] %s21_s24 }
   0x5   :  { %s732_s27 = scalar_lea.hbm %s1024_s1, 2048 }
   0x6   :  { %p733_p0 = scmp.ne.s32.totalorder %s1024_s1, %s732_s27  ;;  %p736_p1 = scmp.lt.u32.totalorder %s732_s27, %s1024_s1 }
   0x8   :  { %p738_p2 = pnand %p736_p1, %p733_p0 }
   0xa   :  { %741 = shalt.err (!%p738_p2)
}
   0xb   :  { %s742_s8 = scalar_lea.vmem %s34_s22, 2048  ;;  %p747_p4 = scmp.lt.s32.totalorder %s34_s22, %s34_s22 }
   0xc   :  { %p743_p3 = scmp.ne.s32.totalorder %s34_s22, %s742_s8  ;;  %p748_p5 = scmp.lt.s32.totalorder %s742_s8, %s742_s8 }
   0xe   :  { %p749_p6 = por %p748_p5, %p747_p4 }
  0x10   :  { %p750_p7 = pnand %p749_p6, %p743_p3 }
  0x12   :  { %753 = shalt.err (!%p750_p7)
}
  0x13   :  { %s852_s9 = smov 128   ;;  %s853_s10 = smov 8  }
  0x14   :  { %39 = dma.hbm_to_vmem [thread:$0]  %s1024_s1, 2048, %s34_s22, [#allocation6], %s852_s9, %s852_s9, %s853_s10  }
  0x15   :  { %s754_s15 = scalar_lea.hbm %s1023_s0, 2048 }
  0x16   :  { %p755_p8 = scmp.ne.s32.totalorder %s1023_s0, %s754_s15  ;;  %p758_p9 = scmp.lt.u32.totalorder %s754_s15, %s1023_s0 }
  0x18   :  { %p760_p10 = pnand %p758_p9, %p755_p8 }
  0x1a   :  { %763 = shalt.err (!%p760_p10)
}
  0x1b   :  { %s764_s20 = scalar_lea.vmem %s892_s24, 2048  ;;  %p769_p12 = scmp.lt.s32.totalorder %s892_s24, %s892_s24 }
  0x1c   :  { %p765_p11 = scmp.ne.s32.totalorder %s892_s24, %s764_s20  ;;  %p770_p13 = scmp.lt.s32.totalorder %s764_s20, %s764_s20 }
  0x1e   :  { %p771_p0 = por %p770_p13, %p769_p12 }
  0x20   :  { %p772_p1 = pnand %p771_p0, %p765_p11 }
  0x22   :  { %775 = shalt.err (!%p772_p1)
}
  0x23   :  { %27 = dma.hbm_to_vmem [thread:$0]  %s1023_s0, 2048, %s892_s24, [#allocation3], %s852_s9, %s852_s9, %s853_s10  }
  0x24   :  { %s854_s22 = smov [#allocation7]   ;;  %s776_s27 = scalar_lea.hbm %s1026_s3, 2048 }
  0x25   :  { %s47_s23 = sshll.u32 %s854_s22, 4  ;;  %p777_p2 = scmp.ne.s32.totalorder %s1026_s3, %s776_s27  ;;  %s48_s23 = int_to_ptr.vmem [resolvable:$true] %s47_s23 }
  0x26   :  { %p780_p3 = scmp.lt.u32.totalorder %s776_s27, %s1026_s3 }
  0x28   :  { %p782_p4 = pnand %p780_p3, %p777_p2 }
  0x2a   :  { %785 = shalt.err (!%p782_p4)
}
  0x2b   :  { %s786_s8 = scalar_lea.vmem %s48_s23, 2048  ;;  %p791_p6 = scmp.lt.s32.totalorder %s48_s23, %s48_s23 }
  0x2c   :  { %p787_p5 = scmp.ne.s32.totalorder %s48_s23, %s786_s8  ;;  %p792_p7 = scmp.lt.s32.totalorder %s786_s8, %s786_s8 }
  0x2e   :  { %p793_p8 = por %p792_p7, %p791_p6 }
  0x30   :  { %p794_p9 = pnand %p793_p8, %p787_p5 }
  0x32   :  { %797 = shalt.err (!%p794_p9)
}
  0x33   :  { %53 = dma.hbm_to_vmem [thread:$0]  %s1026_s3, 2048, %s48_s23, [#allocation6], %s852_s9, %s852_s9, %s853_s10  }
  0x34   :  { %842 = dma.done.wait [#allocation3], 2048  }
  0x35   :  { %843 = vsyncadd [#allocation3], 4294965248 }
  0x36   :  { %844 = dma.done.wait [#allocation6], 4096  }
  0x37   :  { %845 = vsyncadd [#allocation6], 4294963200  ;;  %v81_v0 = vld [vmem:[#allocation5] sm:$0xff]  ;;  %v82_v1 = vld [vmem:[#allocation5 + $0x8] sm:$0xff]  ;;  %s856_s14 = smov [#allocation9]  }
  0x38   :  { %v265_v2 = vld [vmem:[#allocation7] sm:$0xff]  ;;  %v661_v3 = vpack.c.bf16 %v82_v1, %v81_v0  ;;  %v266_v4 = vld [vmem:[#allocation7 + $0x8] sm:$0xff]  ;;  %v83_v5 = vld [vmem:[#allocation5 + $0x10] sm:$0xff]  ;;  %s466_s15 = sshll.u32 %s856_s14, 4  ;;  %s986_s15 = int_to_ptr.vmem [resolvable:$true] %s466_s15 }
  0x39   :  { %v84_v6 = vld [vmem:[#allocation5 + $0x18] sm:$0xff]  ;;  %v693_v7 = vpack.c.bf16 %v266_v4, %v265_v2  ;;  %v267_v9 = vld [vmem:[#allocation7 + $0x10] sm:$0xff]  ;;  %v85_v11 = vld [vmem:[#allocation5 + $0x20] sm:$0xff] }
  0x3a   :  { %v665_v8 = vpack.c.bf16 %v84_v6, %v83_v5  ;;  %v268_v10 = vld [vmem:[#allocation7 + $0x18] sm:$0xff]  ;;  %662 = vmatprep.subr.bf16.mxu0 %v661_v3  ;;  %v86_v13 = vld [vmem:[#allocation5 + $0x28] sm:$0xff]  ;;  %v269_v14 = vld [vmem:[#allocation7 + $0x20] sm:$0xff] }
  0x3b   :  { %v697_v12 = vpack.c.bf16 %v268_v10, %v267_v9  ;;  %v270_v15 = vld [vmem:[#allocation7 + $0x28] sm:$0xff]  ;;  %694 = vmatprep.subr.bf16.mxu1 %v693_v7  ;;  %664 = vmatpush3.bf16.msra.mxu0 %v661_v3  ;;  %v669_v16 = vpack.c.bf16 %v86_v13, %v85_v11  ;;  %v87_v18 = vld [vmem:[#allocation5 + $0x30] sm:$0xff]  ;;  %v88_v19 = vld [vmem:[#allocation5 + $0x38] sm:$0xff] }
  0x3c   :  { %696 = vmatpush3.bf16.msra.mxu1 %v693_v7  ;;  %666 = vmatprep.subr.bf16.mxu0 %v665_v8  ;;  %v701_v17 = vpack.c.bf16 %v270_v15, %v269_v14  ;;  %v271_v20 = vld [vmem:[#allocation7 + $0x30] sm:$0xff]  ;;  %v272_v21 = vld [vmem:[#allocation7 + $0x38] sm:$0xff]  ;;  %v673_v22 = vpack.c.bf16 %v88_v19, %v87_v18  ;;  %v89_v24 = vld [vmem:[#allocation5 + $0x40] sm:$0xff] }
  0x3d   :  { %698 = vmatprep.subr.bf16.mxu1 %v697_v12  ;;  %v705_v23 = vpack.c.bf16 %v272_v21, %v271_v20  ;;  %v90_v25 = vld [vmem:[#allocation5 + $0x48] sm:$0xff]  ;;  %v65_v26 = vld [vmem:[#allocation2] sm:$0xff]  ;;  %v91_v31 = vld [vmem:[#allocation5 + $0x50] sm:$0xff] }
  0x3e   :  { %v273_v27 = vld [vmem:[#allocation7 + $0x40] sm:$0xff]  ;;  %v274_v28 = vld [vmem:[#allocation7 + $0x48] sm:$0xff]  ;;  %581 = vmatprep.mubr.f32.mxu0 %v65_v26  ;;  %637 = vmatprep.mubr.f32.mxu1 %v65_v26  ;;  %v677_v29 = vpack.c.bf16 %v90_v25, %v89_v24  ;;  %v92_v32 = vld [vmem:[#allocation5 + $0x58] sm:$0xff] }
  0x3f   :  { %668 = vmatpush3.bf16.msra.mxu0 %v665_v8  ;;  %v709_v30 = vpack.c.bf16 %v274_v28, %v273_v27  ;;  %v275_v33 = vld [vmem:[#allocation7 + $0x50] sm:$0xff]  ;;  %v276_v34 = vld [vmem:[#allocation7 + $0x58] sm:$0xff]  ;;  %v681_v35 = vpack.c.bf16 %v92_v32, %v91_v31  ;;  %v93_v37 = vld [vmem:[#allocation5 + $0x60] sm:$0xff] }
  0x40   :  { %700 = vmatpush3.bf16.msra.mxu1 %v697_v12  ;;  %670 = vmatprep.subr.bf16.mxu0 %v669_v16  ;;  %v713_v36 = vpack.c.bf16 %v276_v34, %v275_v33  ;;  %v94_v38 = vld [vmem:[#allocation5 + $0x68] sm:$0xff]  ;;  %v277_v39 = vld [vmem:[#allocation7 + $0x60] sm:$0xff]  ;;  %v95_v43 = vld [vmem:[#allocation5 + $0x70] sm:$0xff] }
  0x41   :  { %702 = vmatprep.subr.bf16.mxu1 %v701_v17  ;;  %v278_v40 = vld [vmem:[#allocation7 + $0x68] sm:$0xff]  ;;  %v685_v41 = vpack.c.bf16 %v94_v38, %v93_v37  ;;  %v96_v44 = vld [vmem:[#allocation5 + $0x78] sm:$0xff]  ;;  %v279_v45 = vld [vmem:[#allocation7 + $0x70] sm:$0xff] }
  0x42   :  { %v717_v42 = vpack.c.bf16 %v278_v40, %v277_v39  ;;  %v280_v46 = vld [vmem:[#allocation7 + $0x78] sm:$0xff]  ;;  %v689_v47 = vpack.c.bf16 %v96_v44, %v95_v43  ;;  %v66_v49 = vld [vmem:[#allocation2 + $0x8] sm:$0xff]  ;;  %v67_v50 = vld [vmem:[#allocation2 + $0x10] sm:$0xff] }
  0x43   :  { %672 = vmatpush3.bf16.msra.mxu0 %v669_v16  ;;  %v721_v48 = vpack.c.bf16 %v280_v46, %v279_v45  ;;  %v68_v51 = vld [vmem:[#allocation2 + $0x18] sm:$0xff]  ;;  %v69_v52 = vld [vmem:[#allocation2 + $0x20] sm:$0xff]  ;;  %v70_v53 = vld [vmem:[#allocation2 + $0x28] sm:$0xff] }
  0x44   :  { %704 = vmatpush3.bf16.msra.mxu1 %v701_v17  ;;  %674 = vmatprep.subr.bf16.mxu0 %v673_v22  ;;  %v71_v54 = vld [vmem:[#allocation2 + $0x30] sm:$0xff]  ;;  %v72_v55 = vld [vmem:[#allocation2 + $0x38] sm:$0xff]  ;;  %v73_v56 = vld [vmem:[#allocation2 + $0x40] sm:$0xff] }
  0x45   :  { %706 = vmatprep.subr.bf16.mxu1 %v705_v23  ;;  %v74_v57 = vld [vmem:[#allocation2 + $0x48] sm:$0xff]  ;;  %v75_v58 = vld [vmem:[#allocation2 + $0x50] sm:$0xff]  ;;  %v76_v59 = vld [vmem:[#allocation2 + $0x58] sm:$0xff] }
  0x46   :  { %v77_v60 = vld [vmem:[#allocation2 + $0x60] sm:$0xff]  ;;  %v78_v61 = vld [vmem:[#allocation2 + $0x68] sm:$0xff]  ;;  %v79_v62 = vld [vmem:[#allocation2 + $0x70] sm:$0xff] }
  0x47   :  { %676 = vmatpush3.bf16.msra.mxu0 %v673_v22  ;;  %v80_v63 = vld [vmem:[#allocation2 + $0x78] sm:$0xff]  ;;  %v947_v0 = vld [vmem:[%s1025_s2] ss:$0 sm:$0xff]  ;;  %s855_s2 = smov [#allocation8]  }
  0x48   :  { %708 = vmatpush3.bf16.msra.mxu1 %v705_v23  ;;  %678 = vmatprep.subr.bf16.mxu0 %v677_v29  ;;  %v952_v1 = vld [vmem:[%s1027_s4] ss:$0 sm:$0xff]  ;;  %s454_s4 = sshll.u32 %s855_s2, 4  ;;  %s455_s4 = int_to_ptr.vmem [resolvable:$true] %s454_s4 }
  0x49   :  { %710 = vmatprep.subr.bf16.mxu1 %v709_v30  ;;  %s798_s16 = scalar_lea.vmem %s455_s4, 2048  ;;  %p803_p11 = scmp.lt.s32.totalorder %s455_s4, %s455_s4 }
  0x4a   :  { %p799_p10 = scmp.ne.s32.totalorder %s455_s4, %s798_s16  ;;  %p804_p12 = scmp.lt.s32.totalorder %s798_s16, %s798_s16 }
  0x4b   :  { %680 = vmatpush3.bf16.msra.mxu0 %v677_v29 }
  0x4c   :  { %712 = vmatpush3.bf16.msra.mxu1 %v709_v30  ;;  %682 = vmatprep.subr.bf16.mxu0 %v681_v35  ;;  %p805_p13 = por %p804_p12, %p803_p11 }
  0x4d   :  { %714 = vmatprep.subr.bf16.mxu1 %v713_v36 }
  0x4e   :  { %p806_p0 = pnand %p805_p13, %p799_p10 }
  0x4f   :  { %684 = vmatpush3.bf16.msra.mxu0 %v681_v35 }
  0x50   :  { %716 = vmatpush3.bf16.msra.mxu1 %v713_v36  ;;  %686 = vmatprep.subr.bf16.mxu0 %v685_v41 }
  0x51   :  { %718 = vmatprep.subr.bf16.mxu1 %v717_v42 }
  0x53   :  { %688 = vmatpush3.bf16.msra.mxu0 %v685_v41 }
  0x54   :  { %720 = vmatpush3.bf16.msra.mxu1 %v717_v42  ;;  %690 = vmatprep.subr.bf16.mxu0 %v689_v47 }
  0x55   :  { %722 = vmatprep.subr.bf16.mxu1 %v721_v48 }
  0x57   :  { %692 = vmatpush3.bf16.msra.mxu0 %v689_v47 }
  0x58   :  { %724 = vmatpush3.bf16.msra.mxu1 %v721_v48 }
  0x5a   :  { %582 = vmatmul.mubr.f32.vlgmr.msra.gmra.mrb[0].mxu0 %v66_v49 }
  0x5b   :  { %638 = vmatmul.mubr.f32.vlgmr.msra.gmra.mrb[0].mxu1 %v66_v49  ;;  %584 = vmatprep.mubr.f32.mxu0 %v67_v50 }
  0x5c   :  { %640 = vmatprep.mubr.f32.mxu1 %v67_v50 }
  0x5e   :  { %585 = vmatmul.mubr.f32.gmra.mrb[2].mxu0 %v68_v51 }
  0x5f   :  { %641 = vmatmul.mubr.f32.gmra.mrb[2].mxu1 %v68_v51  ;;  %587 = vmatprep.mubr.f32.mxu0 %v69_v52 }
  0x60   :  { %643 = vmatprep.mubr.f32.mxu1 %v69_v52 }
  0x62   :  { %588 = vmatmul.mubr.f32.gmra.mrb[4].mxu0 %v70_v53 }
  0x63   :  { %644 = vmatmul.mubr.f32.gmra.mrb[4].mxu1 %v70_v53  ;;  %590 = vmatprep.mubr.f32.mxu0 %v71_v54 }
  0x64   :  { %646 = vmatprep.mubr.f32.mxu1 %v71_v54 }
  0x66   :  { %591 = vmatmul.mubr.f32.gmra.mrb[6].mxu0 %v72_v55 }
  0x67   :  { %647 = vmatmul.mubr.f32.gmra.mrb[6].mxu1 %v72_v55  ;;  %593 = vmatprep.mubr.f32.mxu0 %v73_v56 }
  0x68   :  { %649 = vmatprep.mubr.f32.mxu1 %v73_v56 }
  0x6a   :  { %594 = vmatmul.mubr.f32.gmra.mrb[8].mxu0 %v74_v57 }
  0x6b   :  { %650 = vmatmul.mubr.f32.gmra.mrb[8].mxu1 %v74_v57  ;;  %596 = vmatprep.mubr.f32.mxu0 %v75_v58 }
  0x6c   :  { %652 = vmatprep.mubr.f32.mxu1 %v75_v58 }
  0x6e   :  { %597 = vmatmul.mubr.f32.gmra.mrb[10].mxu0 %v76_v59 }
  0x6f   :  { %653 = vmatmul.mubr.f32.gmra.mrb[10].mxu1 %v76_v59  ;;  %599 = vmatprep.mubr.f32.mxu0 %v77_v60 }
  0x70   :  { %655 = vmatprep.mubr.f32.mxu1 %v77_v60 }
  0x72   :  { %600 = vmatmul.mubr.f32.gmra.mrb[12].mxu0 %v78_v61 }
  0x73   :  { %656 = vmatmul.mubr.f32.gmra.mrb[12].mxu1 %v78_v61  ;;  %602 = vmatprep.mubr.f32.mxu0 %v79_v62 }
  0x74   :  { %658 = vmatprep.mubr.f32.mxu1 %v79_v62 }
  0x76   :  { %603 = vmatmul.mubr.f32.gmra.mrb[14].mxu0 %v80_v63 }
  0x77   :  { %659 = vmatmul.mubr.f32.gmra.mrb[14].mxu1 %v80_v63 }
 0x12d   :  { %v583_v2 = vpop.f32.mrb[0].mxu0 }
 0x12e   :  { %v176_v3 = vadd.f32 %v583_v2, %v947_v0  ;;  %v639_v4 = vpop.f32.mrb[0].mxu1  ;;  %v170_v5 = vpop.f32.mrb[1].mxu0 }
 0x12f   :  { %v360_v6 = vadd.f32 %v639_v4, %v952_v1  ;;  %v171_v7 = vadd.f32 %v947_v0, %v170_v5  ;;  %v354_v8 = vpop.f32.mrb[1].mxu1 }
 0x130   :  { %250 = vst [vmem:[#allocation8 + $0x8] sm:$0xff] %v176_v3  ;;  %v355_v9 = vadd.f32 %v952_v1, %v354_v8 }
 0x131   :  { %434 = vst [vmem:[#allocation9 + $0x8] sm:$0xff] %v360_v6  ;;  %249 = vst [vmem:[#allocation8] sm:$0xff] %v171_v7  ;;  %v586_v10 = vpop.f32.mrb[2].mxu0 }
 0x132   :  { %433 = vst [vmem:[#allocation9] sm:$0xff] %v355_v9  ;;  %v186_v11 = vadd.f32 %v586_v10, %v947_v0  ;;  %v642_v12 = vpop.f32.mrb[2].mxu1  ;;  %v180_v13 = vpop.f32.mrb[3].mxu0 }
 0x133   :  { %v370_v14 = vadd.f32 %v642_v12, %v952_v1  ;;  %v181_v15 = vadd.f32 %v947_v0, %v180_v13  ;;  %v364_v16 = vpop.f32.mrb[3].mxu1 }
 0x134   :  { %252 = vst [vmem:[#allocation8 + $0x18] sm:$0xff] %v186_v11  ;;  %v365_v17 = vadd.f32 %v952_v1, %v364_v16 }
 0x135   :  { %436 = vst [vmem:[#allocation9 + $0x18] sm:$0xff] %v370_v14  ;;  %251 = vst [vmem:[#allocation8 + $0x10] sm:$0xff] %v181_v15  ;;  %v589_v18 = vpop.f32.mrb[4].mxu0 }
 0x136   :  { %435 = vst [vmem:[#allocation9 + $0x10] sm:$0xff] %v365_v17  ;;  %v196_v19 = vadd.f32 %v589_v18, %v947_v0  ;;  %v645_v20 = vpop.f32.mrb[4].mxu1  ;;  %v190_v21 = vpop.f32.mrb[5].mxu0 }
 0x137   :  { %v380_v22 = vadd.f32 %v645_v20, %v952_v1  ;;  %v191_v23 = vadd.f32 %v947_v0, %v190_v21  ;;  %v374_v24 = vpop.f32.mrb[5].mxu1 }
 0x138   :  { %254 = vst [vmem:[#allocation8 + $0x28] sm:$0xff] %v196_v19  ;;  %v375_v25 = vadd.f32 %v952_v1, %v374_v24 }
 0x139   :  { %438 = vst [vmem:[#allocation9 + $0x28] sm:$0xff] %v380_v22  ;;  %253 = vst [vmem:[#allocation8 + $0x20] sm:$0xff] %v191_v23  ;;  %v592_v26 = vpop.f32.mrb[6].mxu0 }
 0x13a   :  { %437 = vst [vmem:[#allocation9 + $0x20] sm:$0xff] %v375_v25  ;;  %v206_v27 = vadd.f32 %v592_v26, %v947_v0  ;;  %v648_v28 = vpop.f32.mrb[6].mxu1  ;;  %v200_v29 = vpop.f32.mrb[7].mxu0 }
 0x13b   :  { %v390_v30 = vadd.f32 %v648_v28, %v952_v1  ;;  %v201_v31 = vadd.f32 %v947_v0, %v200_v29  ;;  %v384_v32 = vpop.f32.mrb[7].mxu1 }
 0x13c   :  { %256 = vst [vmem:[#allocation8 + $0x38] sm:$0xff] %v206_v27  ;;  %v385_v33 = vadd.f32 %v952_v1, %v384_v32 }
 0x13d   :  { %440 = vst [vmem:[#allocation9 + $0x38] sm:$0xff] %v390_v30  ;;  %255 = vst [vmem:[#allocation8 + $0x30] sm:$0xff] %v201_v31  ;;  %v595_v34 = vpop.f32.mrb[8].mxu0 }
 0x13e   :  { %439 = vst [vmem:[#allocation9 + $0x30] sm:$0xff] %v385_v33  ;;  %v216_v35 = vadd.f32 %v595_v34, %v947_v0  ;;  %v651_v36 = vpop.f32.mrb[8].mxu1  ;;  %v210_v37 = vpop.f32.mrb[9].mxu0 }
 0x13f   :  { %v400_v38 = vadd.f32 %v651_v36, %v952_v1  ;;  %v211_v39 = vadd.f32 %v947_v0, %v210_v37  ;;  %v394_v40 = vpop.f32.mrb[9].mxu1 }
 0x140   :  { %258 = vst [vmem:[#allocation8 + $0x48] sm:$0xff] %v216_v35  ;;  %v395_v41 = vadd.f32 %v952_v1, %v394_v40 }
 0x141   :  { %442 = vst [vmem:[#allocation9 + $0x48] sm:$0xff] %v400_v38  ;;  %257 = vst [vmem:[#allocation8 + $0x40] sm:$0xff] %v211_v39  ;;  %v598_v42 = vpop.f32.mrb[10].mxu0 }
 0x142   :  { %441 = vst [vmem:[#allocation9 + $0x40] sm:$0xff] %v395_v41  ;;  %v226_v43 = vadd.f32 %v598_v42, %v947_v0  ;;  %v654_v44 = vpop.f32.mrb[10].mxu1  ;;  %v220_v45 = vpop.f32.mrb[11].mxu0 }
 0x143   :  { %v410_v46 = vadd.f32 %v654_v44, %v952_v1  ;;  %v221_v47 = vadd.f32 %v947_v0, %v220_v45  ;;  %v404_v48 = vpop.f32.mrb[11].mxu1 }
 0x144   :  { %260 = vst [vmem:[#allocation8 + $0x58] sm:$0xff] %v226_v43  ;;  %v405_v49 = vadd.f32 %v952_v1, %v404_v48 }
 0x145   :  { %444 = vst [vmem:[#allocation9 + $0x58] sm:$0xff] %v410_v46  ;;  %259 = vst [vmem:[#allocation8 + $0x50] sm:$0xff] %v221_v47  ;;  %v601_v50 = vpop.f32.mrb[12].mxu0 }
 0x146   :  { %443 = vst [vmem:[#allocation9 + $0x50] sm:$0xff] %v405_v49  ;;  %v236_v51 = vadd.f32 %v601_v50, %v947_v0  ;;  %v657_v52 = vpop.f32.mrb[12].mxu1  ;;  %v230_v53 = vpop.f32.mrb[13].mxu0 }
 0x147   :  { %v420_v54 = vadd.f32 %v657_v52, %v952_v1  ;;  %v231_v55 = vadd.f32 %v947_v0, %v230_v53  ;;  %v414_v56 = vpop.f32.mrb[13].mxu1 }
 0x148   :  { %262 = vst [vmem:[#allocation8 + $0x68] sm:$0xff] %v236_v51  ;;  %v415_v57 = vadd.f32 %v952_v1, %v414_v56 }
 0x149   :  { %446 = vst [vmem:[#allocation9 + $0x68] sm:$0xff] %v420_v54  ;;  %261 = vst [vmem:[#allocation8 + $0x60] sm:$0xff] %v231_v55  ;;  %v604_v58 = vpop.f32.mrb[14].mxu0 }
 0x14a   :  { %445 = vst [vmem:[#allocation9 + $0x60] sm:$0xff] %v415_v57  ;;  %v246_v59 = vadd.f32 %v604_v58, %v947_v0  ;;  %v660_v60 = vpop.f32.mrb[14].mxu1  ;;  %v240_v61 = vpop.f32.mrb[15].mxu0 }
 0x14b   :  { %v430_v62 = vadd.f32 %v660_v60, %v952_v1  ;;  %v241_v63 = vadd.f32 %v947_v0, %v240_v61  ;;  %v424_v2 = vpop.f32.mrb[15].mxu1 }
 0x14c   :  { %264 = vst [vmem:[#allocation8 + $0x78] sm:$0xff] %v246_v59  ;;  %v425_v3 = vadd.f32 %v952_v1, %v424_v2 }
 0x14d   :  { %448 = vst [vmem:[#allocation9 + $0x78] sm:$0xff] %v430_v62  ;;  %263 = vst [vmem:[#allocation8 + $0x70] sm:$0xff] %v241_v63 }
 0x14e   :  { %447 = vst [vmem:[#allocation9 + $0x70] sm:$0xff] %v425_v3 }
 0x14f   :  { %809 = shalt.err (!%p806_p0)
}
 0x150   :  { %s810_s19 = scalar_lea.hbm %s1028_s5, 2048 }
 0x151   :  { %p811_p1 = scmp.ne.s32.totalorder %s1028_s5, %s810_s19  ;;  %p814_p2 = scmp.lt.u32.totalorder %s810_s19, %s1028_s5 }
 0x153   :  { %p816_p3 = pnand %p814_p2, %p811_p1 }
 0x155   :  { %819 = shalt.err (!%p816_p3)
}
 0x156   :  { %460 = dma.vmem_to_hbm [thread:$0]  %s455_s4, 2048, %s1028_s5, [#allocation4], %s852_s9, %s852_s9, %s853_s10  }
 0x157   :  { %s820_s26 = scalar_lea.vmem %s986_s15, 2048  ;;  %p825_p5 = scmp.lt.s32.totalorder %s986_s15, %s986_s15 }
 0x158   :  { %p821_p4 = scmp.ne.s32.totalorder %s986_s15, %s820_s26  ;;  %p826_p6 = scmp.lt.s32.totalorder %s820_s26, %s820_s26 }
 0x15a   :  { %p827_p7 = por %p826_p6, %p825_p5 }
 0x15c   :  { %p828_p8 = pnand %p827_p7, %p821_p4 }
 0x15e   :  { %831 = shalt.err (!%p828_p8)
}
 0x15f   :  { %s832_s29 = scalar_lea.hbm %s1029_s6, 2048 }
 0x160   :  { %p833_p9 = scmp.ne.s32.totalorder %s1029_s6, %s832_s29  ;;  %p836_p10 = scmp.lt.u32.totalorder %s832_s29, %s1029_s6 }
 0x162   :  { %p838_p11 = pnand %p836_p10, %p833_p9 }
 0x164   :  { %841 = shalt.err (!%p838_p11)
}
 0x165   :  { %472 = dma.vmem_to_hbm [thread:$0]  %s986_s15, 2048, %s1029_s6, [#allocation10], %s852_s9, %s852_s9, %s853_s10  }
 0x166   :  { %846 = dma.done.wait [#allocation4], 2048  }
 0x167   :  { %847 = vsyncadd [#allocation4], 4294965248 }
 0x168   :  { %848 = dma.done.wait [#allocation10], 2048  }
 0x169   :  { %849 = vsyncadd [#allocation10], 4294965248 }
 0x16a   :  { %479 = vsyncpa [#allocation3], 1 }
 0x16b   :  { %480 = vsyncpa [#allocation6], 1 }
 0x16c   :  { %481 = vsyncpa [#allocation4], 1 }
 0x16d   :  { %482 = vsyncpa [#allocation10], 1 }

</bundles_post_ra>
